<compile_context>
chip_gen: v7x
topology: tpu7x:2x2x1
jax: 0.10.0
libtpu: 0.0.40
codegen_flags: <defaults>
</compile_context>

<pallas_src>
import functools

import jax
import jax.numpy as jnp
from jax.experimental import pallas as pl
from jax.experimental.pallas import tpu as pltpu

_SELU_ALPHA = 1.6732632423543772
_SELU_SCALE = 1.0507009873554805


def _round_up(x, m):
    return ((x + m - 1) // m) * m


def _cdiv(a, b):
    return (a + b - 1) // b


# ---------------------------------------------------------------------------
# Fused GEMM + bias + activation kernel (the only Pallas kernel in the model).
# ---------------------------------------------------------------------------
def _apply_act(x, act):
    if act == "selu":
        pos = jnp.maximum(x, 0.0)
        neg = _SELU_ALPHA * (jnp.exp(jnp.minimum(x, 0.0)) - 1.0)
        return _SELU_SCALE * (pos + neg)
    if act == "sigmoid":
        s = pl.reciprocal(1.0 + jnp.exp(-x), approx=True)  # divide on the EUP
        return jnp.clip(s, 0.0, 1.0)
    return x  # "none"


def _mm_bias_act_kernel(x_ref, w_ref, b_ref, o_ref, *, act):
    acc = jnp.dot(x_ref[...], w_ref[...], preferred_element_type=jnp.float32)
    acc = acc + b_ref[...]                       # f32 epilogue
    o_ref[...] = _apply_act(acc, act).astype(o_ref.dtype)


def matmul_bias_act(x, wp, bp, act, out_dtype, tm=2048):
    """act(x @ wp + bp), tiled over M on the MXU.

    x : (M, K)  any float dtype (cast to bf16 at the kernel boundary)
    wp: (Kp, N) bf16 with K pre-padded to a multiple of 16 (prepare_params)
    bp: (1, N)  f32
    Returns (M, N) in `out_dtype`.  N is never padded: lane-masked stores are
    far cheaper here than the 8-32x HBM write amplification of 128-lane pads.
    """
    M, K = x.shape
    Kp, N = wp.shape
    assert K <= Kp

    g = _cdiv(M, tm)
    if M >= 128:                # >=2 (even) grid steps so v7x megacore splits M
        g = max(g, 2)
        g += g % 2
    tm_eff = _round_up(_cdiv(M, g), 16)   # bf16 sublane packing of the x tile
    Mp = g * tm_eff

    xp = jnp.pad(x.astype(jnp.bfloat16), ((0, Mp - M), (0, Kp - K)))

    out = pl.pallas_call(
        functools.partial(_mm_bias_act_kernel, act=act),
        out_shape=jax.ShapeDtypeStruct((Mp, N), out_dtype),
        grid_spec=pltpu.PrefetchScalarGridSpec(
            num_scalar_prefetch=0,
            grid=(g,),
            in_specs=[
                pl.BlockSpec((tm_eff, Kp), lambda i: (i, 0)),
                pl.BlockSpec((Kp, N), lambda i: (0, 0)),   # weight stays resident
                pl.BlockSpec((1, N), lambda i: (0, 0)),    # bias stays resident
            ],
            out_specs=pl.BlockSpec((tm_eff, N), lambda i: (i, 0)),
        ),
        compiler_params=pltpu.CompilerParams(
            dimension_semantics=("parallel",),
        ),
    )(xp, wp, bp)
    return out[:M]


# ---------------------------------------------------------------------------
# Conv / ConvTranspose layers expressed as patches @ packed-weight GEMMs.
# ---------------------------------------------------------------------------
def _im2col_nhwc(x, k, stride):
    """x: (B, H, W, C) already padded.  Returns (B*OH*OW, k*k*C), OH, OW.

    Column ordering is (dh, dw, c): column index = (dh*k + dw)*C + c.
    """
    B, H, W, C = x.shape
    OH = (H - k) // stride + 1
    OW = (W - k) // stride + 1
    cols = []
    for dh in range(k):
        for dw in range(k):
            cols.append(
                x[:, dh:dh + (OH - 1) * stride + 1:stride,
                     dw:dw + (OW - 1) * stride + 1:stride, :])
    patches = jnp.concatenate(cols, axis=-1)            # (B, OH, OW, k*k*C)
    return patches.reshape(B * OH * OW, k * k * C), OH, OW


def conv2d_nhwc(x, wmat, b, k, stride, pad, act, out_dtype):
    """x: (B,H,W,Cin) NHWC; wmat: packed (Kp, Cout) bf16; b: (1, Cout) f32."""
    B = x.shape[0]
    Cout = wmat.shape[1]
    xp = jnp.pad(x, ((0, 0), (pad, pad), (pad, pad), (0, 0)))
    patches, OH, OW = _im2col_nhwc(xp, k, stride)
    out = matmul_bias_act(patches, wmat, b, act, out_dtype)
    return out.reshape(B, OH, OW, Cout)


def _subpixel_weight(w_t, p):
    """Combined 4-phase weight for ConvTranspose2d(k=3, s=2, out_pad=1).

    w_t: (Cin, Cout, 3, 3) PyTorch ConvTranspose2d weight.
    Returns (2*2*Cin, 4*Cout): rows ordered (dh, dw, ci) over a 2x2 stride-1
    window, columns ordered (ah, aw, co) over the 4 output phases.
    """
    Cin, Cout = w_t.shape[0], w_t.shape[1]

    def tap(a, d):
        if a == 0:                     # phase A: uses kernel taps {2, 0}
            return 2 if d == 0 else 0
        if p == 0:                     # phase B: single tap 1
            return 1 if d == 1 else None
        return 1 if d == 0 else None

    zeros = jnp.zeros((Cin, Cout), w_t.dtype)
    rows = []
    for dh in range(2):
        for dw in range(2):
            cols = []
            for ah in range(2):
                for aw in range(2):
                    th, tw = tap(ah, dh), tap(aw, dw)
                    cols.append(zeros if (th is None or tw is None)
                                else w_t[:, :, th, tw])
            rows.append(jnp.concatenate(cols, axis=1))   # (Cin, 4*Cout)
    return jnp.concatenate(rows, axis=0)                 # (4*Cin, 4*Cout)


def conv_transpose2d_nhwc(x, wmat4, b4, pad, act, out_dtype):
    """Sub-pixel ConvTranspose2d: kernel=3, stride=2, output_padding=1.

    x: (B,H,W,Cin) NHWC; wmat4: packed (Kp, 4*Cout) bf16; b4: (1, 4*Cout) f32.
    Output: (B, 2*(H+1-pad), 2*(W+1-pad), Cout).
    """
    assert pad in (0, 1)
    B = x.shape[0]
    Cout = wmat4.shape[1] // 4
    pad_lo = 1 - pad
    xp = jnp.pad(x, ((0, 0), (pad_lo, 1), (pad_lo, 1), (0, 0)))
    patches, nh, nw = _im2col_nhwc(xp, 2, 1)             # (B*nh*nw, 4*Cin)
    out = matmul_bias_act(patches, wmat4, b4, act, out_dtype)
    out = out.reshape(B, nh, nw, 2, 2, Cout)             # (.., ah, aw, co)
    if pad == 1:                                         # phase -> output slot
        out = out[:, :, :, ::-1, ::-1, :]
    out = out.transpose(0, 1, 3, 2, 4, 5).reshape(B, 2 * nh, 2 * nw, Cout)
    return out


# ---------------------------------------------------------------------------
# One-time weight packing (hoisted out of the per-call forward path).
# ---------------------------------------------------------------------------
def _pack_matrix(wmat):
    """(K, N) f32 -> (round_up(K,16), N) bf16."""
    K = wmat.shape[0]
    return jnp.pad(wmat.astype(jnp.bfloat16), ((0, _round_up(K, 16) - K), (0, 0)))


def pack_conv_weight(w):
    """(Cout, Cin, k, k) PyTorch Conv2d layout -> (Kp, Cout) bf16."""
    Cout, Cin, k, _ = w.shape
    return _pack_matrix(jnp.transpose(w, (2, 3, 1, 0)).reshape(k * k * Cin, Cout))


def pack_deconv_weight(w_t, pad):
    """(Cin, Cout, 3, 3) PyTorch ConvTranspose2d layout -> (Kp, 4*Cout) bf16."""
    return _pack_matrix(_subpixel_weight(w_t, pad))


def pack_bias(b, phases=1):
    return jnp.tile(b.astype(jnp.float32), phases).reshape(1, -1)


def make_params(code_size, key):
    keys = jax.random.split(key, 20)
    it = iter(keys)

    def init(shape, scale=0.05):
        return scale * jax.random.normal(next(it), shape, jnp.float32)

    p = {}
    # encoder convs: (Cout, Cin, 3, 3)
    p["enc1_w"], p["enc1_b"] = init((8, 1, 3, 3)), init((8,))
    p["enc2_w"], p["enc2_b"] = init((16, 8, 3, 3)), init((16,))
    p["enc3_w"], p["enc3_b"] = init((32, 16, 3, 3)), init((32,))
    p["enc4_w"], p["enc4_b"] = init((64, 32, 3, 3)), init((64,))
    # FC layers stored as (in, out)
    p["fc1_w"], p["fc1_b"] = init((64 * 9 * 9, code_size), 0.01), init((code_size,))
    p["fc2_w"], p["fc2_b"] = init((code_size, 64 * 9 * 9), 0.01), init((64 * 9 * 9,))
    # decoder transposed convs: (Cin, Cout, 3, 3) (PyTorch ConvTranspose2d layout)
    p["dec1_w"], p["dec1_b"] = init((64, 32, 3, 3)), init((32,))
    p["dec2_w"], p["dec2_b"] = init((32, 16, 3, 3)), init((16,))
    p["dec3_w"], p["dec3_b"] = init((16, 8, 3, 3)), init((8,))
    p["dec4_w"], p["dec4_b"] = init((8, 1, 3, 3)), init((1,))
    return p


def prepare_params(p):
    """Pack all weights once (bf16, GEMM layout, K padded, biases tiled)."""
    q = {}
    for name in ("enc1", "enc2", "enc3", "enc4"):
        q[name + "_w"] = pack_conv_weight(p[name + "_w"])
        q[name + "_b"] = pack_bias(p[name + "_b"])
    q["fc1_w"], q["fc1_b"] = _pack_matrix(p["fc1_w"]), pack_bias(p["fc1_b"])
    q["fc2_w"], q["fc2_b"] = _pack_matrix(p["fc2_w"]), pack_bias(p["fc2_b"])
    for name, dpad in (("dec1", 0), ("dec2", 1), ("dec3", 1), ("dec4", 1)):
        q[name + "_w"] = pack_deconv_weight(p[name + "_w"], dpad)
        q[name + "_b"] = pack_bias(p[name + "_b"], phases=4)
    return q


# ---------------------------------------------------------------------------
# Forward pass (activations stay NHWC bf16 between layers).
# ---------------------------------------------------------------------------
def autoencoder_forward(params, images, act="selu"):
    B = images.shape[0]
    bf16 = jnp.bfloat16
    x = jnp.transpose(images, (0, 2, 3, 1)).astype(bf16)               # NCHW -> NHWC
    # ---- encode ----
    x = conv2d_nhwc(x, params["enc1_w"], params["enc1_b"], 3, 2, 1, act, bf16)  # (B,75,75, 8)
    x = conv2d_nhwc(x, params["enc2_w"], params["enc2_b"], 3, 2, 1, act, bf16)  # (B,38,38,16)
    x = conv2d_nhwc(x, params["enc3_w"], params["enc3_b"], 3, 2, 1, act, bf16)  # (B,19,19,32)
    x = conv2d_nhwc(x, params["enc4_w"], params["enc4_b"], 3, 2, 0, act, bf16)  # (B, 9, 9,64)
    # PyTorch flattens in NCHW order; this transpose is on a tiny tensor.
    flat = jnp.transpose(x, (0, 3, 1, 2)).reshape(B, 64 * 9 * 9)
    code = matmul_bias_act(flat, params["fc1_w"], params["fc1_b"], act, jnp.float32)
    # ---- decode ----
    out = matmul_bias_act(code, params["fc2_w"], params["fc2_b"], act, bf16)
    out = jnp.transpose(out.reshape(B, 64, 9, 9), (0, 2, 3, 1))        # NHWC (B,9,9,64)
    out = conv_transpose2d_nhwc(out, params["dec1_w"], params["dec1_b"], 0, act, bf16)  # (B, 20, 20,32)
    out = conv_transpose2d_nhwc(out, params["dec2_w"], params["dec2_b"], 1, act, bf16)  # (B, 40, 40,16)
    out = conv_transpose2d_nhwc(out, params["dec3_w"], params["dec3_b"], 1, act, bf16)  # (B, 80, 80, 8)
    out = conv_transpose2d_nhwc(out, params["dec4_w"], params["dec4_b"], 1, "sigmoid",
                                jnp.float32)                                            # (B,160,160, 1)
    out = jnp.transpose(out, (0, 3, 1, 2))                             # NHWC -> NCHW
    return out, code


# ---------------------------------------------------------------------------
# Numerical parity references (PyTorch Conv2d / ConvTranspose2d semantics).
# ---------------------------------------------------------------------------
def _conv2d_ref(x_nchw, w, b, stride, pad):
    out = jax.lax.conv_general_dilated(
        x_nchw, w, window_strides=(stride, stride),
        padding=[(pad, pad), (pad, pad)],
        dimension_numbers=("NCHW", "OIHW", "NCHW"),
        precision=jax.lax.Precision.HIGHEST)
    return out + b[None, :, None, None]


def _conv_transpose2d_ref(x_nchw, w_t, b, pad):
    # ConvTranspose2d(k=3, s=2, padding=pad, output_padding=1) as a dilated conv.
    w_flip = jnp.transpose(jnp.flip(w_t, (2, 3)), (1, 0, 2, 3))  # (Cout,Cin,3,3)
    out = jax.lax.conv_general_dilated(
        x_nchw, w_flip, window_strides=(1, 1),
        padding=[(2 - pad, 3 - pad), (2 - pad, 3 - pad)],
        lhs_dilation=(2, 2),
        dimension_numbers=("NCHW", "OIHW", "NCHW"),
        precision=jax.lax.Precision.HIGHEST)
    return out + b[None, :, None, None]


def _bf16_grid(a):
    # Snap test values to the bf16 grid so the kernel (bf16 inputs) and the
    # f32 reference see identical values; remaining diff is accumulation only.
    return a.astype(jnp.bfloat16).astype(jnp.float32)


def _max_rel_err(a, b):
    return float(jnp.max(jnp.abs(a - b)) / (jnp.max(jnp.abs(b)) + 1e-6))


def _parity_checks(key):
    k1, k2, k3, k4 = jax.random.split(key, 4)
    # Conv2d parity (stride 2, pad 1, odd Cin exercises the K-padding path).
    x = _bf16_grid(jax.random.normal(k1, (2, 5, 11, 11), jnp.float32))
    w = _bf16_grid(0.1 * jax.random.normal(k2, (7, 5, 3, 3), jnp.float32))
    b = 0.1 * jax.random.normal(k3, (7,), jnp.float32)
    mine = conv2d_nhwc(jnp.transpose(x, (0, 2, 3, 1)), pack_conv_weight(w),
                       pack_bias(b), 3, 2, 1, "none", jnp.float32)
    mine = jnp.transpose(mine, (0, 3, 1, 2))
    ref = _conv2d_ref(x, w, b, 2, 1)
    assert mine.shape == ref.shape, (mine.shape, ref.shape)
    assert _max_rel_err(mine, ref) < 1e-2
    # ConvTranspose2d parity for both padding variants used by the decoder.
    for dpad in (0, 1):
        kx, kw, kb, k4 = jax.random.split(k4, 4)
        x = _bf16_grid(jax.random.normal(kx, (2, 6, 5, 5), jnp.float32))
        w_t = _bf16_grid(0.1 * jax.random.normal(kw, (6, 3, 3, 3), jnp.float32))
        b = 0.1 * jax.random.normal(kb, (3,), jnp.float32)
        mine = conv_transpose2d_nhwc(jnp.transpose(x, (0, 2, 3, 1)),
                                     pack_deconv_weight(w_t, dpad),
                                     pack_bias(b, phases=4), dpad, "none",
                                     jnp.float32)
        mine = jnp.transpose(mine, (0, 3, 1, 2))
        ref = _conv_transpose2d_ref(x, w_t, b, dpad)
        assert mine.shape == ref.shape, (mine.shape, ref.shape)
        assert _max_rel_err(mine, ref) < 1e-2


if __name__ == "__main__":
    key = jax.random.PRNGKey(0)
    pkey, xkey, tkey = jax.random.split(key, 3)

    # Validate the conv / sub-pixel transposed-conv lowering numerically.
    _parity_checks(tkey)

    code_size = 32
    batch = 2
    # 150x150 is the input spatial size implied by the hard-coded 64*9*9 FC dim.
    images = jax.random.uniform(xkey, (batch, 1, 150, 150), jnp.float32)
    params = make_params(code_size, pkey)
    prepped = jax.jit(prepare_params)(params)      # one-time weight packing

    fwd = jax.jit(autoencoder_forward)
    out, code = fwd(prepped, images)
    out, code = jax.block_until_ready((out, code))

    assert out.shape == (batch, 1, 160, 160), out.shape
    assert code.shape == (batch, code_size), code.shape
    assert bool(jnp.all(jnp.isfinite(out))) and bool(jnp.all(jnp.isfinite(code)))
    assert bool(jnp.all(out >= 0.0)) and bool(jnp.all(out <= 1.0))  # sigmoid output
    print("KERNEL_OK")
</pallas_src>

<mosaic_0001>
module attributes {stable_mosaic.version = 11 : i64} {
  func.func @_mm_bias_act_kernel(%arg0: i32, %arg1: memref<80x48xbf16, #tpu.memory_space<vmem>>, %arg2: memref<48x7xbf16, #tpu.memory_space<vmem>>, %arg3: memref<1x7xf32, #tpu.memory_space<vmem>>, %arg4: memref<80x7xf32, #tpu.memory_space<vmem>>) attributes {dimension_semantics = [#tpu.dimension_semantics<parallel>], iteration_bounds = array<i64: 1>, scalar_prefetch = 0 : i64, scratch_operands = 0 : i64, tpu.core_type = #tpu.core_type<tc>, window_params = [{transform_indices = @transform_0, window_bounds = array<i64: 80, 48>}, {pipeline_mode = #tpu.pipeline_mode<synchronous>, transform_indices = @transform_1, window_bounds = array<i64: 48, 7>}, {pipeline_mode = #tpu.pipeline_mode<synchronous>, transform_indices = @transform_2, window_bounds = array<i64: 1, 7>}, {transform_indices = @transform_3, window_bounds = array<i64: 80, 7>}]} {
    %c0 = arith.constant 0 : index
    %c0_0 = arith.constant 0 : index
    %0 = vector.load %arg1[%c0, %c0_0] : memref<80x48xbf16, #tpu.memory_space<vmem>>, vector<80x48xbf16>
    %c0_1 = arith.constant 0 : index
    %c0_2 = arith.constant 0 : index
    %1 = vector.load %arg2[%c0_1, %c0_2] : memref<48x7xbf16, #tpu.memory_space<vmem>>, vector<48x7xbf16>
    %cst = arith.constant dense<0.000000e+00> : vector<80x7xf32>
    %2 = tpu.matmul %0, %1, %cst {dimension_numbers = #tpu.dot_dimension_numbers<[1], [0], [0], [1], [0, 0, 1, 1], [], []>} : vector<80x48xbf16>, vector<48x7xbf16>, vector<80x7xf32> -> vector<80x7xf32>
    %c0_3 = arith.constant 0 : index
    %c0_4 = arith.constant 0 : index
    %3 = vector.load %arg3[%c0_3, %c0_4] : memref<1x7xf32, #tpu.memory_space<vmem>>, vector<1x7xf32>
    %4 = vector.broadcast %3 : vector<1x7xf32> to vector<80x7xf32>
    %5 = arith.addf %2, %4 : vector<80x7xf32>
    %c0_5 = arith.constant 0 : index
    %c0_6 = arith.constant 0 : index
    %6 = vector.load %arg4[%c0_5, %c0_6] : memref<80x7xf32, #tpu.memory_space<vmem>>, vector<80x7xf32>
    tpu.vector_store %arg4[%c0_5, %c0_6], %5 {strides = array<i32>} : memref<80x7xf32, #tpu.memory_space<vmem>>, vector<80x7xf32>,
    return
  }
  func.func @transform_0(%arg0: i32) -> (i32, i32) {
    %c0_i32 = arith.constant 0 : i32
    %c0_i32_0 = arith.constant 0 : i32
    return %arg0, %c0_i32 : i32, i32
  }
  func.func @transform_1(%arg0: i32) -> (i32, i32) {
    %c0_i32 = arith.constant 0 : i32
    %c0_i32_0 = arith.constant 0 : i32
    %c0_i32_1 = arith.constant 0 : i32
    return %c0_i32, %c0_i32_0 : i32, i32
  }
  func.func @transform_2(%arg0: i32) -> (i32, i32) {
    %c0_i32 = arith.constant 0 : i32
    %c0_i32_0 = arith.constant 0 : i32
    %c0_i32_1 = arith.constant 0 : i32
    return %c0_i32, %c0_i32_0 : i32, i32
  }
  func.func @transform_3(%arg0: i32) -> (i32, i32) {
    %c0_i32 = arith.constant 0 : i32
    %c0_i32_0 = arith.constant 0 : i32
    return %arg0, %c0_i32 : i32, i32
  }
}

</mosaic_0001>

<bundles_post_ra>
// kernel: tpu_custom_call.1
= control target key start
LH: loop header
LB: loop body
LE: loop exit
PB: predicated region body
PF: predicated region fallthrough
CT: control target
= control target key end

     0   :  { %v249_v0 = vmov 0.0   ;;  %vm250_vm0 = vmmov 0   ;;  %vm81_vm1 = vcmask 392192   ;;  %vm170_vm2 = vcmask 56320   ;;  %s343_s1 = inlined_call_operand.vmem [shape: bf16[48,7], index: 1, kind: input, shape index: {}]   ;;  %s344_s0 = inlined_call_operand.vmem [shape: bf16[80,48], index: 0, kind: input, shape index: {}]   ;;  %s345_s2 = inlined_call_operand.vmem [shape: f32[1,7], index: 2, kind: input, shape index: {}]   ;;  %s346_s3 = inlined_call_operand.vmem [shape: f32[80,7], index: 3, kind: output, shape index: {}]  }
   0x1   :  { %207 = vmatprep.subr.bf16.mxu0 %v249_v0  ;;  %v241_v1 = vld [vmem:[%s343_s1] sm:$0xff]   ;;  %233 = vmatprep.subr.bf16.mxu1 %v249_v0  ;;  %v242_v2 = vld [vmem:[%s343_s1 + $0x8] sm:$0xff]   ;;  %v243_v3 = vld [vmem:[%s343_s1 + $0x10] sm:$0xff]  }
   0x2   :  { %213 = vmatprep.mubr.msk.bf16.mxu0 %vm250_vm0, %v249_v0  ;;  %225 = vmatprep.mubr.msk.bf16.mxu1 %vm250_vm0, %v249_v0  ;;  %v244_v4 = vld [vmem:[%s344_s0] sm:$0xff]   ;;  %v245_v5 = vld [vmem:[%s344_s0 + $0x18] sm:$0xff]   ;;  %v246_v6 = vld [vmem:[%s344_s0 + $0x8] sm:$0xff]  }
   0x3   :  { %208 = vmatpush3.bf16.msra.mxu0 %v241_v1  ;;  %236 = vmatpush3.bf16.msra.mxu1 %v241_v1  ;;  %v247_v7 = vld [vmem:[%s344_s0 + $0x20] sm:$0xff]   ;;  %v248_v8 = vld [vmem:[%s344_s0 + $0x10] sm:$0xff]  }
   0x4   :  { %209 = vmatprep.subr.bf16.mxu0 %v249_v0  ;;  %234 = vmatprep.subr.bf16.mxu1 %v249_v0  ;;  %v185_v9 = vld [vmem:[%s345_s2] ss:$0 sm:$0xff] }
   0x7   :  { %210 = vmatpush3.bf16.msra.mxu0 %v242_v2  ;;  %237 = vmatpush3.bf16.msra.mxu1 %v242_v2 }
   0x8   :  { %211 = vmatprep.subr.bf16.mxu0 %v249_v0  ;;  %235 = vmatprep.subr.bf16.mxu1 %v249_v0 }
   0xb   :  { %212 = vmatpush3.bf16.msra.mxu0 %v243_v3  ;;  %238 = vmatpush3.bf16.msra.mxu1 %v243_v3 }
   0xe   :  { %214 = vmatmul.mubr.msk.bf16.vlgmr.msra.gmra.mrb[0].mxu0 %vm81_vm1, %v244_v4  ;;  %226 = vmatmul.mubr.msk.bf16.vlgmr.msra.gmra.mrb[0].mxu1 %vm81_vm1, %v245_v5 }
   0xf   :  { %217 = vmatprep.mubr.msk.bf16.mxu0 %vm250_vm0, %v249_v0  ;;  %229 = vmatprep.mubr.msk.bf16.mxu1 %vm250_vm0, %v249_v0 }
  0x16   :  { %218 = vmatmul.mubr.msk.bf16.gmra.mrb[4].mxu0 %vm81_vm1, %v246_v6  ;;  %230 = vmatmul.mubr.msk.bf16.gmra.mrb[4].mxu1 %vm81_vm1, %v247_v7 }
  0x17   :  { %221 = vmatprep.mubr.msk.bf16.mxu0 %vm250_vm0, %v249_v0 }
  0x1e   :  { %222 = vmatmul.mubr.msk.bf16.gmra.mrb[8].mxu0 %vm81_vm1, %v248_v8 }
  0xe1   :  { %v131_v10 = vpop.f32.mrb[0].mxu0  ;;  %v155_v11 = vpop.f32.mrb[0].mxu1 }
  0xe2   :  { %v132_v12 = vadd.f32 %v185_v9, %v131_v10  ;;  %v215_v13 = vpop.f32.mrb[1].mxu0  ;;  %v156_v14 = vadd.f32 %v185_v9, %v155_v11  ;;  %v227_v15 = vpop.f32.mrb[1].mxu1 }
  0xe3   :  { %v134_v16 = vpop.f32.mrb[2].mxu0  ;;  %v158_v17 = vpop.f32.mrb[2].mxu1 }
  0xe4   :  { %171 = vst.msk [vmem:[%s346_s3] sm:$0xff] %vm170_vm2, %v132_v12  ;;  %v135_v18 = vadd.f32 %v185_v9, %v134_v16  ;;  %v216_v19 = vpop.f32.mrb[3].mxu0  ;;  %177 = vst.msk [vmem:[%s346_s3 + $0x30] sm:$0xff] %vm170_vm2, %v156_v14  ;;  %v159_v20 = vadd.f32 %v185_v9, %v158_v17  ;;  %v228_v21 = vpop.f32.mrb[3].mxu1 }
  0xe6   :  { %172 = vst.msk [vmem:[%s346_s3 + $0x8] sm:$0xff] %vm170_vm2, %v135_v18  ;;  %178 = vst.msk [vmem:[%s346_s3 + $0x38] sm:$0xff] %vm170_vm2, %v159_v20 }
  0xe9   :  { %v139_v22 = vpop.f32.mrb[4].mxu0  ;;  %v163_v23 = vpop.f32.mrb[4].mxu1 }
  0xea   :  { %v140_v24 = vadd.f32 %v185_v9, %v139_v22  ;;  %v219_v25 = vpop.f32.mrb[5].mxu0  ;;  %v164_v26 = vadd.f32 %v185_v9, %v163_v23  ;;  %v231_v27 = vpop.f32.mrb[5].mxu1 }
  0xeb   :  { %v142_v28 = vpop.f32.mrb[6].mxu0  ;;  %v166_v29 = vpop.f32.mrb[6].mxu1 }
  0xec   :  { %173 = vst.msk [vmem:[%s346_s3 + $0x10] sm:$0xff] %vm170_vm2, %v140_v24  ;;  %v143_v30 = vadd.f32 %v185_v9, %v142_v28  ;;  %v220_v31 = vpop.f32.mrb[7].mxu0  ;;  %179 = vst.msk [vmem:[%s346_s3 + $0x40] sm:$0xff] %vm170_vm2, %v164_v26  ;;  %v167_v32 = vadd.f32 %v185_v9, %v166_v29  ;;  %v232_v33 = vpop.f32.mrb[7].mxu1 }
  0xee   :  { %174 = vst.msk [vmem:[%s346_s3 + $0x18] sm:$0xff] %vm170_vm2, %v143_v30  ;;  %180 = vst.msk [vmem:[%s346_s3 + $0x48] sm:$0xff] %vm170_vm2, %v167_v32 }
  0xf1   :  { %v147_v34 = vpop.f32.mrb[8].mxu0 }
  0xf2   :  { %v148_v35 = vadd.f32 %v185_v9, %v147_v34  ;;  %v223_v36 = vpop.f32.mrb[9].mxu0 }
  0xf3   :  { %v150_v37 = vpop.f32.mrb[10].mxu0 }
  0xf4   :  { %175 = vst.msk [vmem:[%s346_s3 + $0x20] sm:$0xff] %vm170_vm2, %v148_v35  ;;  %v151_v38 = vadd.f32 %v185_v9, %v150_v37  ;;  %v224_v39 = vpop.f32.mrb[11].mxu0 }
  0xf6   :  { %176 = vst.msk [vmem:[%s346_s3 + $0x28] sm:$0xff] %vm170_vm2, %v151_v38 }

</bundles_post_ra>
